<compile_context>
chip_gen: v6e
topology: v6e:2x2x1
jax: 0.10.0
libtpu: 0.0.40
codegen_flags: <defaults>
</compile_context>

<pallas_src>
import functools

import jax
import jax.numpy as jnp
from jax.experimental import pallas as pl
from jax.experimental.pallas import tpu as pltpu


def _layernorm_kernel(x_ref, o_ref, *, eps):
    # x_ref: (tile_rows, F) block in VMEM
    x = x_ref[...].astype(jnp.float32)
    mean = jnp.mean(x, axis=-1, keepdims=True)
    xm = x - mean
    # torch.var(..., unbiased=False) == mean of squared deviations
    var = jnp.mean(xm * xm, axis=-1, keepdims=True)
    y = xm * jax.lax.rsqrt(var + eps)
    o_ref[...] = y.astype(o_ref.dtype)


def _layernorm_affine_kernel(x_ref, g_ref, b_ref, o_ref, *, eps):
    x = x_ref[...].astype(jnp.float32)
    mean = jnp.mean(x, axis=-1, keepdims=True)
    xm = x - mean
    var = jnp.mean(xm * xm, axis=-1, keepdims=True)
    y = xm * jax.lax.rsqrt(var + eps)
    y = y * g_ref[...].astype(jnp.float32) + b_ref[...].astype(jnp.float32)
    o_ref[...] = y.astype(o_ref.dtype)


def _choose_tile_rows(rows, num_features):
    # Target ~4 MiB of f32 per row-tile.  Live VMEM is roughly
    # 2x input tile (double-buffered) + 2x output tile + f32 intermediates
    # ~= 5x tile bytes -> ~20 MiB, comfortably under v7x's 64 MiB physical VMEM
    # and covered by the raised vmem_limit on v5e/v6e.
    target_bytes = 4 * 1024 * 1024
    t = target_bytes // max(1, num_features * 4)
    t = max(8, min(t, 1024))
    t = (t // 8) * 8  # sublane alignment
    # Keep at least 2 grid steps when there is enough work, so the "parallel"
    # grid axis can shard across both v7x TensorCores.
    if rows >= 16:
        half = (((rows + 1) // 2) + 7) // 8 * 8
        t = min(t, max(8, half))
    return t


def my_layer_norm(x, num_features, eps=1e-5, affine=False, gamma=None, beta=None,
                  tile_rows=None):
    """Forward pass of MyLayerNorm.

    x: (..., num_features).  If affine, gamma/beta have shape (num_features,).
    """
    assert x.shape[-1] == num_features

    orig_shape = x.shape
    rows = 1
    for d in orig_shape[:-1]:
        rows *= d
    x2d = x.reshape(rows, num_features)

    if tile_rows is None:
        tile_rows = _choose_tile_rows(rows, num_features)

    # No wrapper-side padding: Pallas masks out-of-bounds writes of the ragged
    # last block; padded rows never reach the output.
    grid = (pl.cdiv(rows, tile_rows),)

    x_spec = pl.BlockSpec((tile_rows, num_features), lambda i: (i, 0))
    o_spec = pl.BlockSpec((tile_rows, num_features), lambda i: (i, 0))

    if affine:
        assert gamma is not None and beta is not None
        g = gamma.reshape(1, num_features)
        b = beta.reshape(1, num_features)
        kernel = functools.partial(_layernorm_affine_kernel, eps=eps)
        in_specs = [
            x_spec,
            # Invariant across the grid (index_map is constant) -> no re-DMA.
            pl.BlockSpec((1, num_features), lambda i: (0, 0)),
            pl.BlockSpec((1, num_features), lambda i: (0, 0)),
        ]
        args = (x2d, g, b)
    else:
        # Non-affine path: dedicated kernel, no synthetic ones/zeros traffic.
        kernel = functools.partial(_layernorm_kernel, eps=eps)
        in_specs = [x_spec]
        args = (x2d,)

    out = pl.pallas_call(
        kernel,
        out_shape=jax.ShapeDtypeStruct((rows, num_features), x.dtype),
        grid_spec=pltpu.PrefetchScalarGridSpec(
            num_scalar_prefetch=0,
            grid=grid,
            in_specs=in_specs,
            out_specs=o_spec,
        ),
        compiler_params=pltpu.CompilerParams(
            dimension_semantics=("parallel",),
            vmem_limit_bytes=64 * 1024 * 1024,
        ),
    )(*args)

    return out.reshape(orig_shape)


if __name__ == "__main__":
    key = jax.random.PRNGKey(0)
    batch, seq, hidden = 2, 8, 32
    # NOTE: hidden=32 (< 128 lanes) is lane-sparse; for production shapes keep
    # num_features a multiple of 128 for full lane utilization.

    x = jax.random.normal(key, (batch, seq, hidden), dtype=jnp.float32)

    # Deterministic parameter init (matches torch.nn.Parameter(ones/zeros)).
    gamma = jnp.ones((hidden,), dtype=jnp.float32)
    beta = jnp.zeros((hidden,), dtype=jnp.float32)

    # Default module config: affine=False
    y = my_layer_norm(x, num_features=hidden, eps=1e-5, affine=False)
    y = jax.block_until_ready(y)

    # Affine config exercised as well (gamma=1, beta=0 deterministic init).
    y_aff = my_layer_norm(x, num_features=hidden, eps=1e-5, affine=True,
                          gamma=gamma, beta=beta)
    y_aff = jax.block_until_ready(y_aff)

    # Sanity check against a pure-JAX reference of the PyTorch forward.
    mean = jnp.mean(x, axis=-1, keepdims=True)
    var = jnp.mean((x - mean) ** 2, axis=-1, keepdims=True)
    ref = (x - mean) / jnp.sqrt(var + 1e-5)
    assert jnp.max(jnp.abs(y - ref)) < 1e-5
    assert jnp.max(jnp.abs(y_aff - ref)) < 1e-5

    print("KERNEL_OK")
</pallas_src>

<mosaic_0001>
module attributes {stable_mosaic.version = 11 : i64} {
  func.func @_layernorm_kernel(%arg0: i32, %arg1: memref<8x32xf32, #tpu.memory_space<vmem>>, %arg2: memref<8x32xf32, #tpu.memory_space<vmem>>) attributes {dimension_semantics = [#tpu.dimension_semantics<parallel>], iteration_bounds = array<i64: 2>, scalar_prefetch = 0 : i64, scratch_operands = 0 : i64, tpu.core_type = #tpu.core_type<tc>, window_params = [{transform_indices = @transform_0, window_bounds = array<i64: 8, 32>}, {transform_indices = @transform_1, window_bounds = array<i64: 8, 32>}]} {
    %c0 = arith.constant 0 : index
    %c0_0 = arith.constant 0 : index
    %0 = vector.load %arg1[%c0, %c0_0] : memref<8x32xf32, #tpu.memory_space<vmem>>, vector<8x32xf32>
    %cst = arith.constant dense<0.000000e+00> : vector<8xf32>
    %1 = vector.multi_reduction <add>, %0, %cst [1] : vector<8x32xf32> to vector<8xf32>
    %2 = vector.shape_cast %1 : vector<8xf32> to vector<8x1xf32>
    %cst_1 = arith.constant 3.200000e+01 : f32
    %3 = vector.broadcast %cst_1 : f32 to vector<8x1xf32>
    %4 = arith.divf %2, %3 : vector<8x1xf32>
    %5 = vector.broadcast %4 : vector<8x1xf32> to vector<8x32xf32>
    %6 = arith.subf %0, %5 : vector<8x32xf32>
    %7 = arith.mulf %6, %6 : vector<8x32xf32>
    %cst_2 = arith.constant dense<0.000000e+00> : vector<8xf32>
    %8 = vector.multi_reduction <add>, %7, %cst_2 [1] : vector<8x32xf32> to vector<8xf32>
    %9 = vector.shape_cast %8 : vector<8xf32> to vector<8x1xf32>
    %cst_3 = arith.constant 3.200000e+01 : f32
    %10 = vector.broadcast %cst_3 : f32 to vector<8x1xf32>
    %11 = arith.divf %9, %10 : vector<8x1xf32>
    %cst_4 = arith.constant 9.99999974E-6 : f32
    %12 = vector.broadcast %cst_4 : f32 to vector<8x1xf32>
    %13 = arith.addf %11, %12 : vector<8x1xf32>
    %14 = math.rsqrt %13 : vector<8x1xf32>
    %15 = vector.broadcast %14 : vector<8x1xf32> to vector<8x32xf32>
    %16 = arith.mulf %6, %15 : vector<8x32xf32>
    %c0_5 = arith.constant 0 : index
    %c0_6 = arith.constant 0 : index
    %17 = vector.load %arg2[%c0_5, %c0_6] : memref<8x32xf32, #tpu.memory_space<vmem>>, vector<8x32xf32>
    tpu.vector_store %arg2[%c0_5, %c0_6], %16 {strides = array<i32>} : memref<8x32xf32, #tpu.memory_space<vmem>>, vector<8x32xf32>,
    return
  }
  func.func @transform_0(%arg0: i32) -> (i32, i32) {
    %c0_i32 = arith.constant 0 : i32
    %c0_i32_0 = arith.constant 0 : i32
    return %arg0, %c0_i32 : i32, i32
  }
  func.func @transform_1(%arg0: i32) -> (i32, i32) {
    %c0_i32 = arith.constant 0 : i32
    %c0_i32_0 = arith.constant 0 : i32
    return %arg0, %c0_i32 : i32, i32
  }
}

</mosaic_0001>

<bundles_post_ra>
// kernel: tpu_custom_call.1
= control target key start
LH: loop header
LB: loop body
LE: loop exit
PB: predicated region body
PF: predicated region fallthrough
CT: control target
= control target key end

     0   :  { %6 = vsyncpa [#allocation3], 0  ;;  %s543_s0 = inlined_call_operand.hbm [shape: f32[16,32], index: 0, kind: input, shape index: {}]   ;;  %s544_s1 = inlined_call_operand.hbm [shape: f32[16,32], index: 1, kind: output, shape index: {}]  }
   0x1   :  { %8 = vsyncpa [#allocation3 + $0x1], 0 }
   0x2   :  { %9 = vsyncpa [#allocation4], 0 }
   0x3   :  { %11 = vsyncpa [#allocation4 + $0x1], 0  ;;  %s399_s6 = smov 0   ;;  %s401_s7 = smov 0  }
   0x4   :  { %s403_s8 = smov 0   ;;  %s405_s9 = smov 0  }
   0x5 LB: > { %s420_s10 = sadd.s32 4294967295, %s385_s9   ;;  %s233_s11 = sadd.s32 4294967294, %s385_s9   ;;  %s385_s9 = sphi %s405_s9, %s561_s9   ;;  %s381_s8 = sphi %s403_s8, %s560_s8   ;;  %s377_s7 = sphi %s401_s7, %s559_s7   ;;  %s373_s6 = sphi %s399_s6, %s558_s6  }
   0x6   : > { %s424_s12 = sadd.s32 1, %s385_s9   ;;  %s24_s13 = sadd.s32 1, %s381_s8 }
   0x7   : > { %s21_s14 = ssub.s32 %s385_s9, %s424_s12  ;;  %p31_p0 = scmp.ne.s32.totalorder %s381_s8, %s377_s7 }
   0x8   : > { %p22_p1 = scmp.eq.s32.totalorder %s21_s14, 0  ;;  %p32_p2 = scmp.eq.s32.totalorder %s385_s9, 0 }
   0x9   : > { %p37_p3 = scmp.ne.s32.totalorder %s377_s7, %s373_s6  ;;  %p38_p4 = scmp.eq.s32.totalorder %s420_s10, 0 }
   0xa   : > { %s436_s15 = scalar_select %p22_p1, %s381_s8, %s24_s13  }
   0xb   : > { %p438_p5 = por %p32_p2, %p31_p0  ;;  %p442_p6 = por %p38_p4, %p37_p3 }
   0xc   : > { %p61_p7 = scmp.eq.s32.totalorder %s420_s10, 1  ;;  %p67_p8 = scmp.eq.s32.totalorder %s233_s11, 1 }
   0xd   : > { %s548_s17 = scalar_select %p442_p6, 1, 0 }
   0xe   : > { %p257_p10 = scmp.lt.s32.totalorder %s385_s9, 2  ;;  %p449_p11 = por %p61_p7, %p31_p0 }
   0xf   : > { %p453_p12 = por %p67_p8, %p37_p3  ;;  %s87_s20 = sand.u32 1, %s381_s8  }
  0x10   : > { %s549_s18 = scalar_select %p449_p11, 1, 0 }
  0x11   : > { %s550_s19 = scalar_select %p453_p12, 1, 0 }
  0x12   : > { %s237_s21 = sshll.u32 %s385_s9, 7  ;;  %s236_s22 = sshll.u32 %s87_s20, 3 }
  0x13   : > { %s462_s25 = scalar_lea.hbm %s543_s0, %s237_s21  ;;  %s91_s26 = scalar_lea.vmem [#allocation2], %s236_s22 }
  0x14   : > { %s98_s27 = sshll.u32 %s91_s26, 4  ;;  %p466_p13 = pnand %p257_p10, %p438_p5  ;;  %s470_s27 = int_to_ptr.vmem [resolvable:$true] %s98_s27 }
  0x15   : > { %s88_s29 = scalar_lea.sflag [#allocation3], %s87_s20  ;;  %s293_s30 = scalar_lea.hbm %s462_s25, 128 }
  0x16   : > { %p294_p2 = scmp.ne.s32.totalorder %s462_s25, %s293_s30  ;;  %p295_p3 = pneg %p466_p13 }
  0x17   : > { %s298_s4 = scalar_lea.hbm %s543_s0, 256  ;;  %p299_p5 = scmp.lt.s32.totalorder %s462_s25, %s543_s0 }
  0x18   : > { %p296_p4 = pnand %p295_p3, %p294_p2  ;;  %p300_p8 = scmp.lt.s32.totalorder %s298_s4, %s293_s30 }
  0x1a   : > { %p297_p7 = pneg %p296_p4  ;;  %p301_p10 = por %p300_p8, %p299_p5 }
  0x1c   : > { %p302_p9 = pnand %p301_p10, %p297_p7 }
  0x1e   : > { %305 = shalt.err (!%p302_p9)
}
  0x1f   : > { %s306_s13 = scalar_lea.vmem %s470_s27, 128  ;;  %s387_s14 = smov [#allocation2]  }
  0x20   : > { %p307_p0 = scmp.ne.s32.totalorder %s470_s27, %s306_s13  ;;  %s311_s16 = sshll.u32 %s387_s14, 4  ;;  %s312_s16 = int_to_ptr.vmem [resolvable:$false] %s311_s16 }
  0x21   : > { %s313_s20 = scalar_lea.vmem %s312_s16, 256  ;;  %p314_p4 = scmp.lt.s32.totalorder %s470_s27, %s312_s16 }
  0x22   : > { %p309_p1 = pnand %p307_p0, %p295_p3  ;;  %p315_p12 = scmp.lt.s32.totalorder %s313_s20, %s306_s13 }
  0x24   : > { %p310_p2 = pneg %p309_p1  ;;  %p316_p11 = por %p315_p12, %p314_p4 }
  0x26   : > { %p317_p6 = pnand %p316_p11, %p310_p2 }
  0x28   : > { %320 = shalt.err (!%p317_p6)
}
  0x29   : > { %252 = dma.hbm_to_vmem [thread:$0]  (!%p466_p13), %s462_s25, 128, %s470_s27, %s88_s29  }
  0x2a   : > { %p552_p9 = scmp.lt.s32.totalorder %s385_s9, 3  ;;  %p553_p7 = scmp.ge.s32.totalorder %s385_s9, 1 }
  0x2c   : > { %p104_p0 = pnand %p553_p7, %p552_p9 }
  0x2d   : > { %s497_s21 = sand.u32 (!%p104_p0), 1, %s377_s7   ;;  %p554_p6 = scmp.ne.s32.totalorder (!%p104_p0), %s548_s17, 0 }
  0x2e   : > { %107 = sbr.rel (%p104_p0) target bundleno = 370 (0x172), region = 24  ;;  %s239_s22 = sshll.u32 (!%p104_p0), %s497_s21, 3 }
  0x2f   : > { %s110_s23 = scalar_lea.sflag (!%p104_p0), [#allocation3], %s497_s21  ;;  %s113_s24 = scalar_lea.vmem (!%p104_p0), [#allocation2], %s239_s22 }
  0x33   : > { %364 = dma.done.wait (%p554_p6), %s110_s23, 128  }
  0x34   : > { %366 = vsyncadd (%p554_p6), %s110_s23, 4294967168  ;;  %vm133_vm0 = vcmask 261120   ;;  %v132_v0 = vld [vmem:[%s113_s24] sm:$0xff]  ;;  %s242_s17 = sshll.u32 %s420_s10, 7  ;;  %s131_s25 = scalar_lea.vmem [#allocation5], %s239_s22 }
  0x35   : > { %v134_v1 = vsel %vm133_vm0, %v132_v0, 0.0  ;;  %s163_s26 = sshll.u32 %s131_s25, 4  ;;  %s161_s29 = scalar_lea.hbm %s544_s1, %s242_s17  ;;  %s164_s26 = int_to_ptr.vmem [resolvable:$true] %s163_s26 }
  0x36   : > { %135 = vadd.xlane.f32.xlu0 %v134_v1  ;;  %s150_s30 = scalar_lea.sflag [#allocation4], %s497_s21  ;;  %s321_s2 = scalar_lea.vmem %s164_s26, 128 }
  0x37   : > { %p322_p11 = scmp.ne.s32.totalorder %s164_s26, %s321_s2  ;;  %p555_p12 = scmp.ne.s32.totalorder %s549_s18, 0 }
  0x38   : > { %s388_s3 = smov [#allocation5]  }
  0x39   : > { %p323_p13 = pnand %p322_p11, %p555_p12  ;;  %s325_s4 = sshll.u32 %s388_s3, 4  ;;  %s326_s4 = int_to_ptr.vmem [resolvable:$false] %s325_s4 }
  0x3a   : > { %s327_s10 = scalar_lea.vmem %s326_s4, 256  ;;  %p328_p3 = scmp.lt.s32.totalorder %s164_s26, %s326_s4 }
  0x3b   : > { %p324_p1 = pneg %p323_p13  ;;  %p329_p5 = scmp.lt.s32.totalorder %s327_s10, %s321_s2 }
  0x3d   : > { %p330_p8 = por %p329_p5, %p328_p3 }
  0x3f   : > { %p331_p10 = pnand %p330_p8, %p324_p1 }
  0xbf   : > { %v136_v2 = vpop.xlane.xlu0 %135 }
  0xc0   : > { %v138_v3 = vmul.f32 0.03125, %v136_v2 }
  0xc2   : > { %v139_v4 = vsub.f32 %v132_v0, %v138_v3 }
  0xc4   : > { %v140_v5 = vmul.f32 %v139_v4, %v139_v4 }
  0xc6   : > { %v141_v6 = vsel %vm133_vm0, %v140_v5, 0.0 }
  0xc7   : > { %142 = vadd.xlane.f32.xlu0 %v141_v6 }
 0x150   : > { %v143_v7 = vpop.xlane.xlu0 %142 }
 0x151   : > { %v144_v8 = vmul.f32 0.03125, %v143_v7 }
 0x153   : > { %v145_v9 = vadd.f32 1e-05, %v144_v8 }
 0x155   : > { %291 = vrsqrt.f32 %v145_v9 }
 0x162   : > { %v292_v10 = vpop.eup %291 }
 0x163   : > { %v147_v11 = vmul.f32 %v292_v10, %v139_v4 }
 0x165   : > { %148 = vst.msk [vmem:[%s131_s25] sm:$0xff] %vm133_vm0, %v147_v11 }
 0x166   : > { %334 = shalt.err (!%p331_p10)
}
 0x167   : > { %s335_s5 = scalar_lea.hbm %s161_s29, 128  ;;  %s339_s14 = scalar_lea.hbm %s544_s1, 256 }
 0x168   : > { %p336_p2 = scmp.ne.s32.totalorder %s161_s29, %s335_s5  ;;  %p340_p7 = scmp.lt.s32.totalorder %s161_s29, %s544_s1 }
 0x169   : > { %p341_p0 = scmp.lt.s32.totalorder %s339_s14, %s335_s5 }
 0x16a   : > { %p337_p4 = pnand %p336_p2, %p555_p12 }
 0x16b   : > { %p342_p6 = por %p341_p0, %p340_p7 }
 0x16c   : > { %p338_p9 = pneg %p337_p4 }
 0x16e   : > { %p343_p11 = pnand %p342_p6, %p338_p9 }
 0x170   : > { %346 = shalt.err (!%p343_p11)
}
 0x171   : > { %247 = dma.vmem_to_hbm [thread:$0]  (%p555_p12), %s164_s26, 128, %s161_s29, %s150_s30  }
 0x172 PF: > { %s175_s21 = sand.u32 1, %s373_s6   ;;  %p556_p13 = scmp.ne.s32.totalorder %s550_s19, 0 }
 0x173   : > { %p557_p1 = scmp.ge.s32.totalorder %s385_s9, 2  ;;  %s176_s22 = scalar_lea.sflag [#allocation4], %s175_s21 }
 0x175   : > { %p254_p3 = pnand %p557_p1, %p556_p13 }
 0x177   : > { %p255_p5 = pneg %p254_p3 }
 0x179   : > { %368 = dma.done.wait (%p255_p5), %s176_s22, 128  }
 0x17a   : > { %370 = vsyncadd (%p255_p5), %s176_s22, 4294967168  ;;  %p14_p8 = scmp.ge.s32.totalorder %s424_s12, 4   ;;  %s558_s6 = smov %s377_s7 }
 0x17b   : > { %s559_s7 = smov %s381_s8  ;;  %s560_s8 = smov %s436_s15 }
 0x17c   : > { %s561_s9 = smov %s424_s12  ;;  %16 = sbr.rel (!%p14_p8) target bundleno = 5 (0x5), region = 69 }
 0x181   :  { %181 = vsyncpa [#allocation3], 1 }
 0x182   :  { %183 = vsyncpa [#allocation3 + $0x1], 1 }
 0x183   :  { %184 = vsyncpa [#allocation4], 1 }
 0x184   :  { %186 = vsyncpa [#allocation4 + $0x1], 1 }

</bundles_post_ra>
